<compile_context>
chip_gen: v5e
topology: v5e:2x2
jax: 0.10.0
libtpu: 0.0.40
codegen_flags: <defaults>
</compile_context>

<pallas_src>
import math
from functools import partial

import jax
import jax.numpy as jnp
from jax.experimental import pallas as pl
from jax.experimental.pallas import tpu as pltpu


_MIN_GRID_STEPS = 4                    # >= 2 * TensorCores (v7x) and enough for overlap
_DEFAULT_VMEM_CAP = 64 * 1024 * 1024   # smallest VMEM across v5e/v6e/v7x (v7x: 64 MiB)


def _vmem_capacity_bytes():
    """Chip VMEM capacity, with a conservative fallback if the query fails."""
    try:
        cap = getattr(pltpu.get_tpu_info(), "vmem_capacity_bytes", None)
        if cap:
            return int(cap)
    except Exception:
        pass
    return _DEFAULT_VMEM_CAP


def _conv_sigmoid_gate(y, w_ref):
    """K-tap zero-padded Conv1d over channels + sigmoid.

    y:     (bt, C, 1) float32 pooled means, channels on the sublane axis.
    w_ref: (K,) float32 Conv1d weights in SMEM.
    Returns the (bt, C, 1) float32 gate (channels still on sublanes, so the
    caller's broadcast multiply over H*W is a stride-0 lane broadcast).
    """
    bt, C, _ = y.shape
    K = w_ref.shape[0]
    pad = K // 2
    if pad > 0:
        zeros = jnp.zeros((bt, pad, 1), dtype=jnp.float32)
        yp = jnp.concatenate([zeros, y, zeros], axis=1)      # (bt, C + 2*pad, 1)
    else:
        yp = y
    acc = jnp.zeros_like(y)
    for j in range(K):                                       # K tiny & static
        acc = acc + w_ref[j] * yp[:, j:j + C, :]
    return jax.nn.sigmoid(acc)                               # (bt, C, 1) f32


# --------------------------------------------------------------------------
# Fused single-kernel path: per grid step, one (bt, C, HW) block.
# --------------------------------------------------------------------------
def _eca_fused_kernel(w_ref, x_ref, o_ref):
    # 1) AdaptiveAvgPool2d(1): spatial lives on lanes -> one lane reduce per
    #    vreg row; keepdims keeps channels on sublanes (no gate transpose).
    y = jnp.mean(x_ref[...], axis=-1, keepdims=True, dtype=jnp.float32)   # (bt, C, 1)
    # 2)+3) Conv1d over channels + sigmoid, in f32.
    s = _conv_sigmoid_gate(y, w_ref)                                      # (bt, C, 1)
    # 4) x * gate: re-read x_ref (second streaming pass over the VMEM block),
    #    multiply in the native dtype.
    o_ref[...] = (x_ref[...] * s.astype(o_ref.dtype)).astype(o_ref.dtype)


# --------------------------------------------------------------------------
# Two-pass fallback: pool(+gate) pass over spatial chunks, then scale pass.
# Used when a single batch element's (C, HW) slab exceeds the block budget.
# --------------------------------------------------------------------------
def _eca_pool_gate_kernel(w_ref, x_ref, g_ref, acc_ref, *, inv_hw):
    s_idx = pl.program_id(1)

    @pl.when(s_idx == 0)
    def _():
        acc_ref[...] = jnp.zeros_like(acc_ref)

    acc_ref[...] += jnp.sum(x_ref[...].astype(jnp.float32), axis=-1, keepdims=True)

    @pl.when(s_idx == pl.num_programs(1) - 1)
    def _():
        g_ref[...] = _conv_sigmoid_gate(acc_ref[...] * inv_hw, w_ref)


def _eca_scale_kernel(g_ref, x_ref, o_ref):
    o_ref[...] = (x_ref[...] * g_ref[...].astype(o_ref.dtype)).astype(o_ref.dtype)


# --------------------------------------------------------------------------
# Tiling policy helpers.
# --------------------------------------------------------------------------
def _pick_batch_tile(batch, per_batch_bytes, budget_bytes, min_steps):
    """Largest divisor bt of `batch` whose block fits the budget while keeping
    at least `min_steps` grid steps (clamped to `batch`)."""
    min_steps = min(min_steps, batch)
    best = 1
    for bt in range(1, batch + 1):
        if batch % bt:
            continue
        if bt * per_batch_bytes > budget_bytes:
            continue
        if batch // bt < min_steps:
            continue
        best = bt
    return best


def _pick_spatial_chunk(hw, bytes_per_spatial, budget_bytes):
    """Largest multiple-of-128 divisor of HW that fits the budget (lane-dense,
    unmasked stores).  Falls back to HW if no such divisor exists."""
    candidates = [d for d in range(128, hw + 1, 128) if hw % d == 0]
    if not candidates:
        # TODO(synk): pad HW to a multiple of 128 for very small/ragged maps.
        return hw
    fitting = [d for d in candidates if d * bytes_per_spatial <= budget_bytes]
    return max(fitting) if fitting else min(candidates)


def _vmem_limit(block_bytes, vmem_cap):
    # in + out blocks, each double-buffered by the pipeline (4x), plus headroom;
    # clamped to the chip's physical VMEM (64 MiB on v7x, 128 MiB on v5e/v6e).
    return int(min(vmem_cap, max(32 * 1024 * 1024,
                                 4 * block_bytes + 4 * 1024 * 1024)))


# --------------------------------------------------------------------------
# Wrappers.
# --------------------------------------------------------------------------
def _eca_fused(x3, w, per_batch_bytes, max_block_bytes, vmem_cap):
    B, C, HW = x3.shape
    bt = _pick_batch_tile(B, per_batch_bytes, max_block_bytes, _MIN_GRID_STEPS)
    vmem_limit = _vmem_limit(bt * per_batch_bytes, vmem_cap)
    return pl.pallas_call(
        _eca_fused_kernel,
        out_shape=jax.ShapeDtypeStruct((B, C, HW), x3.dtype),
        grid_spec=pltpu.PrefetchScalarGridSpec(
            num_scalar_prefetch=0,
            grid=(B // bt,),
            in_specs=[
                pl.BlockSpec(memory_space=pltpu.MemorySpace.SMEM),   # (K,) weights
                pl.BlockSpec((bt, C, HW), lambda b: (b, 0, 0)),      # x block
            ],
            out_specs=pl.BlockSpec((bt, C, HW), lambda b: (b, 0, 0)),
        ),
        compiler_params=pltpu.CompilerParams(
            dimension_semantics=("parallel",),
            vmem_limit_bytes=vmem_limit,
        ),
    )(w, x3)


def _eca_two_pass(x3, w, itemsize, max_block_bytes, vmem_cap):
    B, C, HW = x3.shape
    chunk = _pick_spatial_chunk(HW, C * itemsize, max_block_bytes)
    n_chunks = HW // chunk
    vmem_limit = _vmem_limit(C * chunk * itemsize, vmem_cap)

    # Pass 1: spatial-chunked global average pool; conv+sigmoid gate on the
    # last chunk (channels stay on sublanes throughout).
    gate = pl.pallas_call(
        partial(_eca_pool_gate_kernel, inv_hw=1.0 / float(HW)),
        out_shape=jax.ShapeDtypeStruct((B, C, 1), jnp.float32),
        grid_spec=pltpu.PrefetchScalarGridSpec(
            num_scalar_prefetch=0,
            grid=(B, n_chunks),
            in_specs=[
                pl.BlockSpec(memory_space=pltpu.MemorySpace.SMEM),
                pl.BlockSpec((1, C, chunk), lambda b, s: (b, 0, s)),
            ],
            out_specs=pl.BlockSpec((1, C, 1), lambda b, s: (b, 0, 0)),
            scratch_shapes=[pltpu.VMEM((1, C, 1), jnp.float32)],
        ),
        compiler_params=pltpu.CompilerParams(
            dimension_semantics=("parallel", "arbitrary"),
            vmem_limit_bytes=vmem_limit,
        ),
    )(w, x3)

    # Pass 2: elementwise x * gate (gate broadcast over the spatial lanes).
    return pl.pallas_call(
        _eca_scale_kernel,
        out_shape=jax.ShapeDtypeStruct((B, C, HW), x3.dtype),
        grid_spec=pltpu.PrefetchScalarGridSpec(
            num_scalar_prefetch=0,
            grid=(B, n_chunks),
            in_specs=[
                pl.BlockSpec((1, C, 1), lambda b, s: (b, 0, 0)),      # gate
                pl.BlockSpec((1, C, chunk), lambda b, s: (b, 0, s)),  # x block
            ],
            out_specs=pl.BlockSpec((1, C, chunk), lambda b, s: (b, 0, s)),
        ),
        compiler_params=pltpu.CompilerParams(
            dimension_semantics=("parallel", "parallel"),
            vmem_limit_bytes=vmem_limit,
        ),
    )(gate, x3)


def eca_net(x, conv_weight, *, max_block_bytes=None):
    """x: (B, C, H, W); conv_weight: (1, 1, K) with odd K.  Returns (B, C, H, W)."""
    B, C, H, W = x.shape
    HW = H * W
    K = conv_weight.shape[-1]
    assert K % 2 == 1, "ECA channel conv expects an odd kernel size"

    x3 = x.reshape(B, C, HW)                         # lane-dense last dim (free reshape)
    w = conv_weight.reshape(-1).astype(jnp.float32)  # (K,) for SMEM

    itemsize = jnp.dtype(x.dtype).itemsize
    per_batch_bytes = C * HW * itemsize

    vmem_cap = _vmem_capacity_bytes()
    if max_block_bytes is None:
        # 1-8 MiB streaming blocks already reach ~85% of HBM roofline; cap/8
        # keeps the double-buffered in+out blocks (4x) well inside even v7x.
        max_block_bytes = min(8 * 1024 * 1024, vmem_cap // 8)

    if per_batch_bytes <= max_block_bytes:
        out3 = _eca_fused(x3, w, per_batch_bytes, max_block_bytes, vmem_cap)
    else:
        out3 = _eca_two_pass(x3, w, itemsize, max_block_bytes, vmem_cap)
    return out3.reshape(B, C, H, W)


def eca_reference(x, conv_weight):
    """Plain-JAX reference mirroring the PyTorch forward."""
    xf = x.astype(jnp.float32)
    y = jnp.mean(xf, axis=(2, 3))                    # (B, C)
    K = conv_weight.shape[-1]
    pad = K // 2
    C = x.shape[1]
    yp = jnp.pad(y, ((0, 0), (pad, pad)))
    acc = jnp.zeros_like(y)
    for j in range(K):
        acc = acc + conv_weight[0, 0, j] * yp[:, j:j + C]
    s = jax.nn.sigmoid(acc)
    return (xf * s[:, :, None, None]).astype(x.dtype)


if __name__ == "__main__":
    # Module config: in_channel=16 -> kernel_size=int(|(log2(16)+1)/2|)=2 -> even -> K=3
    in_channel = 16
    b_const, gama = 1, 2
    ks = int(abs((math.log(in_channel, 2) + b_const) / gama))
    K = ks if ks % 2 else ks + 1

    B, C, H, W = 2, in_channel, 16, 16

    key = jax.random.PRNGKey(0)
    kx, kw = jax.random.split(key)
    x = jax.random.normal(kx, (B, C, H, W), dtype=jnp.float32)
    bound = 1.0 / math.sqrt(K)
    conv_weight = jax.random.uniform(kw, (1, 1, K), dtype=jnp.float32,
                                     minval=-bound, maxval=bound)

    ref = eca_reference(x, conv_weight)

    # Fused single-kernel path (default tiling / VMEM policy; bt=1, grid=(2,)).
    out = jax.block_until_ready(eca_net(x, conv_weight))
    assert out.shape == (B, C, H, W)
    assert jnp.allclose(out, ref, atol=1e-5, rtol=1e-5), "fused path mismatch"

    # Two-pass fallback (pool+gate pass, then scale pass), forced by a tiny
    # block budget so the VMEM-overflow path is actually exercised.
    out2 = jax.block_until_ready(eca_net(x, conv_weight, max_block_bytes=8 * 1024))
    assert out2.shape == (B, C, H, W)
    assert jnp.allclose(out2, ref, atol=1e-5, rtol=1e-5), "two-pass path mismatch"

    print("KERNEL_OK")
</pallas_src>

<mosaic_0001>
module attributes {stable_mosaic.version = 11 : i64} {
  func.func @_eca_fused_kernel(%arg0: i32, %arg1: memref<3xf32, #tpu.memory_space<smem>>, %arg2: memref<1x16x256xf32, #tpu.memory_space<vmem>>, %arg3: memref<1x16x256xf32, #tpu.memory_space<vmem>>) attributes {dimension_semantics = [#tpu.dimension_semantics<parallel>], iteration_bounds = array<i64: 2>, scalar_prefetch = 0 : i64, scratch_operands = 0 : i64, tpu.core_type = #tpu.core_type<tc>, window_params = [{transform_indices = @transform_0, window_bounds = array<i64: 3>}, {transform_indices = @transform_1, window_bounds = array<i64: 1, 16, 256>}, {transform_indices = @transform_2, window_bounds = array<i64: 1, 16, 256>}]} {
    %c0 = arith.constant 0 : index
    %c0_0 = arith.constant 0 : index
    %c0_1 = arith.constant 0 : index
    %0 = vector.load %arg2[%c0, %c0_0, %c0_1] : memref<1x16x256xf32, #tpu.memory_space<vmem>>, vector<1x16x256xf32>
    %cst = arith.constant dense<0.000000e+00> : vector<1x16xf32>
    %1 = vector.multi_reduction <add>, %0, %cst [2] : vector<1x16x256xf32> to vector<1x16xf32>
    %2 = vector.shape_cast %1 : vector<1x16xf32> to vector<1x16x1xf32>
    %cst_2 = arith.constant 2.560000e+02 : f32
    %3 = vector.broadcast %cst_2 : f32 to vector<1x16x1xf32>
    %4 = arith.divf %2, %3 : vector<1x16x1xf32>
    %cst_3 = arith.constant 0.000000e+00 : f32
    %5 = vector.broadcast %cst_3 : f32 to vector<1x1x1xf32>
    %6 = tpu.concatenate %5, %4, %5 in 1 : vector<1x1x1xf32>, vector<1x16x1xf32>, vector<1x1x1xf32> -> vector<1x18x1xf32>
    %cst_4 = arith.constant 0.000000e+00 : f32
    %7 = vector.broadcast %cst_4 : f32 to vector<1x16x1xf32>
    %c0_5 = arith.constant 0 : index
    %8 = memref.load %arg1[%c0_5] : memref<3xf32, #tpu.memory_space<smem>>
    %9 = vector.extract_strided_slice %6 {offsets = [0, 0, 0], sizes = [1, 16, 1], strides = [1, 1, 1]} : vector<1x18x1xf32> to vector<1x16x1xf32>
    %10 = vector.broadcast %8 : f32 to vector<1x16x1xf32>
    %11 = arith.mulf %10, %9 : vector<1x16x1xf32>
    %12 = arith.addf %7, %11 : vector<1x16x1xf32>
    %c1 = arith.constant 1 : index
    %13 = memref.load %arg1[%c1] : memref<3xf32, #tpu.memory_space<smem>>
    %14 = vector.extract_strided_slice %6 {offsets = [0, 1, 0], sizes = [1, 16, 1], strides = [1, 1, 1]} : vector<1x18x1xf32> to vector<1x16x1xf32>
    %15 = vector.broadcast %13 : f32 to vector<1x16x1xf32>
    %16 = arith.mulf %15, %14 : vector<1x16x1xf32>
    %17 = arith.addf %12, %16 : vector<1x16x1xf32>
    %c2 = arith.constant 2 : index
    %18 = memref.load %arg1[%c2] : memref<3xf32, #tpu.memory_space<smem>>
    %19 = vector.extract_strided_slice %6 {offsets = [0, 2, 0], sizes = [1, 16, 1], strides = [1, 1, 1]} : vector<1x18x1xf32> to vector<1x16x1xf32>
    %20 = vector.broadcast %18 : f32 to vector<1x16x1xf32>
    %21 = arith.mulf %20, %19 : vector<1x16x1xf32>
    %22 = arith.addf %17, %21 : vector<1x16x1xf32>
    %23 = arith.negf %22 : vector<1x16x1xf32>
    %24 = math.exp %23 : vector<1x16x1xf32>
    %cst_6 = arith.constant 1.000000e+00 : f32
    %25 = vector.broadcast %cst_6 : f32 to vector<1x16x1xf32>
    %26 = arith.addf %25, %24 : vector<1x16x1xf32>
    %27 = arith.divf %25, %26 : vector<1x16x1xf32>
    %c0_7 = arith.constant 0 : index
    %c0_8 = arith.constant 0 : index
    %c0_9 = arith.constant 0 : index
    %28 = vector.load %arg2[%c0_7, %c0_8, %c0_9] : memref<1x16x256xf32, #tpu.memory_space<vmem>>, vector<1x16x256xf32>
    %29 = vector.broadcast %27 : vector<1x16x1xf32> to vector<1x16x256xf32>
    %30 = arith.mulf %28, %29 : vector<1x16x256xf32>
    %c0_10 = arith.constant 0 : index
    %c0_11 = arith.constant 0 : index
    %c0_12 = arith.constant 0 : index
    %31 = vector.load %arg3[%c0_10, %c0_11, %c0_12] : memref<1x16x256xf32, #tpu.memory_space<vmem>>, vector<1x16x256xf32>
    tpu.vector_store %arg3[%c0_10, %c0_11, %c0_12], %30 {strides = array<i32>} : memref<1x16x256xf32, #tpu.memory_space<vmem>>, vector<1x16x256xf32>,
    return
  }
  func.func @transform_0(%arg0: i32) -> i32 {
    %c0_i32 = arith.constant 0 : i32
    %c0_i32_0 = arith.constant 0 : i32
    return %c0_i32 : i32
  }
  func.func @transform_1(%arg0: i32) -> (i32, i32, i32) {
    %c0_i32 = arith.constant 0 : i32
    %c0_i32_0 = arith.constant 0 : i32
    %c0_i32_1 = arith.constant 0 : i32
    return %arg0, %c0_i32, %c0_i32_0 : i32, i32, i32
  }
  func.func @transform_2(%arg0: i32) -> (i32, i32, i32) {
    %c0_i32 = arith.constant 0 : i32
    %c0_i32_0 = arith.constant 0 : i32
    %c0_i32_1 = arith.constant 0 : i32
    return %arg0, %c0_i32, %c0_i32_0 : i32, i32, i32
  }
}

</mosaic_0001>

<bundles_post_ra>
// kernel: tpu_custom_call.1
= control target key start
LH: loop header
LB: loop body
LE: loop exit
PB: predicated region body
PF: predicated region fallthrough
CT: control target
= control target key end

     0   :  { %7 = vsyncpa [#allocation5], 0  ;;  %s805_s0 = inlined_call_operand.hbm [shape: f32[3], index: 0, kind: input, shape index: {}]   ;;  %s806_s1 = inlined_call_operand.hbm [shape: f32[2,16,256], index: 1, kind: input, shape index: {}]   ;;  %s807_s2 = inlined_call_operand.hbm [shape: f32[2,16,256], index: 2, kind: output, shape index: {}]  }
   0x1   :  { %8 = vsyncpa [#allocation3], 0 }
   0x2   :  { %10 = vsyncpa [#allocation3 + $0x1], 0 }
   0x3   :  { %11 = vsyncpa [#allocation4], 0 }
   0x4   :  { %13 = vsyncpa [#allocation4 + $0x1], 0  ;;  %s643_s9 = smov 0   ;;  %s645_s10 = smov 0  }
   0x5   :  { %s647_s11 = smov 0   ;;  %s649_s12 = smov 0  }
   0x6 LB: > { %s664_s13 = sadd.s32 4294967295, %s619_s12   ;;  %s407_s14 = sadd.s32 4294967294, %s619_s12   ;;  %s619_s12 = sphi %s649_s12, %s818_s12   ;;  %s615_s11 = sphi %s647_s11, %s817_s11   ;;  %s611_s10 = sphi %s645_s10, %s816_s10   ;;  %s607_s9 = sphi %s643_s9, %s815_s9  }
   0x7   : > { %s668_s15 = sadd.s32 1, %s619_s12   ;;  %s47_s16 = sadd.s32 1, %s615_s11 }
   0x8   : > { %s44_s17 = ssub.s32 %s619_s12, %s668_s15  ;;  %p54_p0 = scmp.ne.s32.totalorder %s615_s11, %s611_s10 }
   0x9   : > { %p45_p1 = scmp.eq.s32.totalorder %s44_s17, 0  ;;  %p55_p2 = scmp.eq.s32.totalorder %s619_s12, 0 }
   0xa   : > { %p60_p3 = scmp.ne.s32.totalorder %s611_s10, %s607_s9  ;;  %p61_p4 = scmp.eq.s32.totalorder %s664_s13, 0 }
   0xb   : > { %s680_s18 = scalar_select %p45_p1, %s615_s11, %s47_s16  }
   0xc   : > { %p682_p5 = por %p55_p2, %p54_p0  ;;  %p688_p6 = por %p61_p4, %p60_p3 }
   0xd   : > { %p84_p7 = scmp.eq.s32.totalorder %s664_s13, 1  ;;  %p90_p8 = scmp.eq.s32.totalorder %s407_s14, 1 }
   0xe   : > { %p408_p9 = scmp.ge.s32.totalorder %s619_s12, 1  ;;  %p97_p10 = scmp.lt.s32.totalorder %s619_s12, 3 }
   0xf   : > { %p695_p11 = por %p84_p7, %p54_p0  ;;  %p699_p12 = por %p90_p8, %p60_p3 }
  0x10   : > { %p703_p13 = pnand %p408_p9, %p97_p10  ;;  %s109_s26 = sshll.u32 %s805_s0, 4  ;;  %s110_s26 = int_to_ptr.hbm [resolvable:$true] %s109_s26 }
  0x11   : > { %p450_p2 = scmp.lt.s32.totalorder %s619_s12, 2  ;;  %s120_s27 = sand.u32 1, %s615_s11  }
  0x12   : > { %p437_p1 = pneg %p703_p13  ;;  %s411_s29 = sshll.u32 %s120_s27, 5 }
  0x13   : > { %p719_p3 = pnand %p450_p2, %p682_p5  ;;  %s621_s30 = smov [#allocation2]  }
  0x14   : > { %p438_p7 = pnand %p437_p1, %p61_p4  ;;  %s427_s3 = sshll.u32 %s619_s12, 5 }
  0x15   : > { %s124_s4 = scalar_lea.vmem [#allocation6], %s411_s29  ;;  %s129_s8 = scalar_lea.hbm %s806_s1, %s427_s3 }
  0x16   : > { %440 = dma.hbm_to_smem (!%p438_p7), %s110_s26, 16, %s621_s30, [#allocation5]  }
  0x17   : > { %s132_s5 = sshll.u32 %s124_s4, 4  ;;  %s130_s14 = sshll.u32 %s129_s8, 4  ;;  %s133_s5 = int_to_ptr.vmem [resolvable:$true] %s132_s5  ;;  %s131_s14 = int_to_ptr.hbm [resolvable:$true] %s130_s14 }
  0x18   : > { %s121_s16 = scalar_lea.sflag [#allocation3], %s120_s27  ;;  %s519_s17 = sshra.s32 %s131_s14, 4  ;;  %s520_s17 = int_to_ptr.hbm [resolvable:$true] %s519_s17 }
  0x19   : > { %s521_s19 = scalar_lea.hbm %s520_s17, 32  ;;  %p523_p8 = pneg %p719_p3 }
  0x1a   : > { %p522_p5 = scmp.ne.s32.totalorder %s520_s17, %s521_s19  ;;  %s526_s26 = scalar_lea.hbm %s806_s1, 64 }
  0x1b   : > { %p527_p1 = scmp.lt.s32.totalorder %s520_s17, %s806_s1  ;;  %p528_p2 = scmp.lt.s32.totalorder %s526_s26, %s521_s19 }
  0x1c   : > { %p524_p9 = pnand %p523_p8, %p522_p5 }
  0x1d   : > { %p529_p7 = por %p528_p2, %p527_p1 }
  0x1e   : > { %p525_p10 = pneg %p524_p9 }
  0x20   : > { %p530_p0 = pnand %p529_p7, %p525_p10 }
  0x22   : > { %533 = shalt.err (!%p530_p0)
}
  0x23   : > { %s622_s27 = smov 256   ;;  %s623_s3 = smov 16  }
  0x24   : > { %444 = dma.hbm_to_vmem [thread:$0]  (!%p719_p3), %s131_s14, 512, %s133_s5, %s121_s16, %s622_s27, %s622_s27, %s623_s3  }
  0x25   : > { %144 = sbr.rel (%p703_p13) target bundleno = 348 (0x15c), region = 28 }
  0x2a   : > { %594 = dma.done.wait (%p61_p4), [#allocation5], 16  }
  0x2b   : > { %596 = vsyncadd (%p61_p4), [#allocation5], 4294967280  ;;  %s744_s4 = sand.u32 1, %s611_s10  }
  0x2c   : > { %s416_s6 = sshll.u32 %s744_s4, 5  ;;  %s152_s7 = scalar_lea.sflag [#allocation3], %s744_s4 }
  0x2d   : > { %s155_s28 = scalar_lea.vmem [#allocation6], %s416_s6 }
  0x2e   : > { %598 = dma.done.wait (%p688_p6), %s152_s7, 512  }
  0x2f   : > { %600 = vsyncadd (%p688_p6), %s152_s7, 4294966784 }
  0x30   : > { %161 = sfence }
  0x31   : > { %v754_v0 = vld [vmem:[%s155_s28] sm:$0xff]  ;;  %v756_v1 = vld [vmem:[%s155_s28 + $0x8] sm:$0xff]  ;;  %v760_v3 = vld [vmem:[%s155_s28 + $0x10] sm:$0xff]  ;;  %v624_v6 = vmov 256.0   ;;  %s418_s20 = sld [smem:[#allocation2 + $0x1]]  ;;  %v625_v15 = vmov 0  }
  0x32   : > { %v182_v2 = vadd.f32 %v756_v1, %v754_v0  ;;  %v762_v4 = vld [vmem:[%s155_s28 + $0x18] sm:$0xff]  ;;  %494 = vrcp.f32 %v624_v6  ;;  %s419_s23 = sld [smem:[#allocation2 + $0x2]]  ;;  %492 = vset.pattern.permute.xlu1 %v625_v15  ;;  %493 = vset.pattern.permute.xlu0 %v625_v15  ;;  %vm199_vm1 = vcmask 1040384   ;;  %vm222_vm2 = vcmask 1046528   ;;  %s428_s8 = sshll.u32 %s664_s13, 5 }
  0x33   : > { %v185_v5 = vadd.f32 %v762_v4, %v760_v3  ;;  %s208_s5 = sld [smem:[#allocation2]]  ;;  %vm240_vm3 = vcmask 1045504   ;;  %s177_s14 = scalar_lea.vmem [#allocation7], %s416_s6 }
  0x34   : > { %183 = vadd.xlane.f32.xlu0 %v182_v2  ;;  %s318_s19 = scalar_lea.hbm %s807_s2, %s428_s8  ;;  %s319_s24 = sshll.u32 %s177_s14, 4  ;;  %s320_s24 = int_to_ptr.vmem [resolvable:$true] %s319_s24 }
  0x35   : > { %s321_s25 = sshll.u32 %s318_s19, 4  ;;  %s307_s13 = scalar_lea.sflag [#allocation4], %s744_s4  ;;  %s322_s25 = int_to_ptr.hbm [resolvable:$true] %s321_s25 }
  0x36   : > { %s563_s26 = sshra.s32 %s322_s25, 4  ;;  %s569_s3 = scalar_lea.hbm %s807_s2, 64  ;;  %s564_s26 = int_to_ptr.hbm [resolvable:$true] %s563_s26 }
  0x37   : > { %v215_v18 = vstv %s418_s20  ;;  %s565_s29 = scalar_lea.hbm %s564_s26, 32  ;;  %p570_p0 = scmp.lt.s32.totalorder %s564_s26, %s807_s2 }
  0x38   : > { %v495_v7 = vpop.eup %494  ;;  %v233_v21 = vstv %s419_s23  ;;  %p566_p4 = scmp.ne.s32.totalorder %s564_s26, %s565_s29  ;;  %p571_p3 = scmp.lt.s32.totalorder %s569_s3, %s565_s29 }
  0x39   : > { %v189_v8 = vmul.f32 256.0, %v495_v7  ;;  %vm193_vm0 = vweird.f32 %v495_v7  ;;  %v209_v24 = vstv %s208_s5 }
  0x3a   : > { %p567_p6 = pnand %p566_p4, %p695_p11  ;;  %p572_p5 = por %p571_p3, %p570_p0 }
  0x3b   : > { %v190_v9 = vsub.f32 1.0, %v189_v8 }
  0x3c   : > { %186 = vadd.xlane.f32.xlu0 %v185_v5  ;;  %p568_p13 = pneg %p567_p6 }
  0x3d   : > { %v191_v10 = vmul.f32 %v495_v7, %v190_v9 }
  0x3e   : > { %p573_p8 = pnand %p572_p5, %p568_p13 }
  0x3f   : > { %v192_v11 = vadd.f32 %v495_v7, %v191_v10 }
  0x41   : > { %v194_v12 = vsel %vm193_vm0, %v495_v7, %v192_v11 }
  0xa7   : > { %v184_v13 = vpop.xlane.xlu0 %183 }
  0xa8   : > { %v195_v14 = vmul.f32 %v194_v12, %v184_v13 }
  0xaa   : > { %v200_v16 = vrot.slane %v195_v14, 7 }
  0xac   : > { %v206_v19 = vsel %vm199_vm1, 0.0, %v200_v16 }
  0xad   : > { %v216_v23 = vmul.f32 %v215_v18, %v206_v19  ;;  %v234_v27 = vmul.f32 %v233_v21, %v206_v19  ;;  %v210_v36 = vmul.f32 %v209_v24, %v206_v19 }
  0xaf   : > { %v187_v17 = vpop.xlane.xlu0 %186  ;;  %v223_v32 = vrot.slane %v216_v23, 1  ;;  %v241_v39 = vrot.slane %v234_v27, 2 }
  0xb0   : > { %v196_v20 = vmul.f32 %v194_v12, %v187_v17 }
  0xb2   : > { %v201_v22 = vrot.slane %v196_v20, 7 }
  0xb4   : > { %v202_v25 = vsel %vm199_vm1, %v200_v16, %v201_v22  ;;  %v207_v26 = vsel %vm199_vm1, %v201_v22, 0.0 }
  0xb5   : > { %v217_v28 = vmul.f32 %v215_v18, %v202_v25  ;;  %v218_v29 = vmul.f32 %v215_v18, %v207_v26  ;;  %v235_v30 = vmul.f32 %v233_v21, %v202_v25  ;;  %v236_v31 = vmul.f32 %v233_v21, %v207_v26 }
  0xb6   : > { %v211_v37 = vmul.f32 %v209_v24, %v202_v25 }
  0xb7   : > { %v224_v33 = vrot.slane %v217_v28, 1  ;;  %v226_v34 = vrot.slane %v218_v29, 1  ;;  %v242_v35 = vrot.slane %v235_v30, 2  ;;  %v244_v38 = vrot.slane %v236_v31, 2 }
  0xb9   : > { %v225_v40 = vsel %vm222_vm2, %v223_v32, %v224_v33  ;;  %v227_v41 = vsel %vm222_vm2, %v224_v33, %v226_v34  ;;  %v243_v44 = vsel %vm240_vm3, %v241_v39, %v242_v35  ;;  %v245_v45 = vsel %vm240_vm3, %v242_v35, %v244_v38 }
  0xba   : > { %v230_v42 = vadd.f32 %v225_v40, %v210_v36  ;;  %v231_v43 = vadd.f32 %v227_v41, %v211_v37 }
  0xbc   : > { %v248_v46 = vadd.f32 %v243_v44, %v230_v42  ;;  %v249_v47 = vadd.f32 %v245_v45, %v231_v43 }
  0xbe   : > { %v420_v48 = vmul.f32 -1.442695, %v248_v46  ;;  %v421_v49 = vmul.f32 -1.442695, %v249_v47 }
  0xc0   : > { %496 = vpow2.f32 %v420_v48 }
  0xc1   : > { %498 = vpow2.f32 %v421_v49 }
  0xc6   : > { %v497_v50 = vpop.eup %496 }
  0xc7   : > { %v499_v51 = vpop.eup %498  ;;  %v256_v52 = vadd.f32 1.0, %v497_v50 }
  0xc8   : > { %v257_v53 = vadd.f32 1.0, %v499_v51 }
  0xc9   : > { %500 = vrcp.f32 %v256_v52  ;;  %v269_v59 = vand.u32 2147483648, %v256_v52  ;;  %v267_v62 = vand.u32 2147483647, %v256_v52  ;;  %vm263_vm5 = vweird.f32 %v256_v52 }
  0xca   : > { %502 = vrcp.f32 %v257_v53  ;;  %v284_v9 = vand.u32 2147483648, %v257_v53  ;;  %vm278_vm9 = vweird.f32 %v257_v53  ;;  %v282_v10 = vand.u32 2147483647, %v257_v53 }
  0xcb   : > { %v270_v5 = vor.u32 1.1754944e-38, %v269_v59  ;;  %vm268_vm7 = vcmp.eq.f32.partialorder %v267_v62, 8.507059e+37 }
  0xcc   : > { %v285_v12 = vor.u32 1.1754944e-38, %v284_v9  ;;  %vm283_vm11 = vcmp.eq.f32.partialorder %v282_v10, 8.507059e+37 }
  0xcf   : > { %v501_v54 = vpop.eup %500 }
  0xd0   : > { %v503_v55 = vpop.eup %502  ;;  %v259_v56 = vmul.f32 %v501_v54, %v256_v52  ;;  %vm264_vm4 = vweird.f32 %v501_v54 }
  0xd1   : > { %v274_v57 = vmul.f32 %v503_v55, %v257_v53  ;;  %vm265_vm6 = vmor %vm263_vm5, %vm264_vm4  ;;  %vm279_vm8 = vweird.f32 %v503_v55 }
  0xd2   : > { %v260_v58 = vsub.f32 1.0, %v259_v56  ;;  %vm280_vm10 = vmor %vm278_vm9, %vm279_vm8 }
  0xd3   : > { %v275_v60 = vsub.f32 1.0, %v274_v57 }
  0xd4   : > { %v261_v61 = vmul.f32 %v501_v54, %v260_v58 }
  0xd5   : > { %v276_v2 = vmul.f32 %v503_v55, %v275_v60 }
  0xd6   : > { %v262_v63 = vadd.f32 %v501_v54, %v261_v61 }
  0xd7   : > { %v277_v8 = vadd.f32 %v503_v55, %v276_v2 }
  0xd8   : > { %v266_v6 = vsel %vm265_vm6, %v501_v54, %v262_v63 }
  0xd9   : > { %v271_v7 = vsel %vm268_vm7, %v270_v5, %v266_v6  ;;  %v281_v11 = vsel %vm280_vm10, %v503_v55, %v277_v8 }
  0xda   : > { %290 = vperm.xlu1 %492, %v271_v7   ;;  %v286_v13 = vsel %vm283_vm11, %v285_v12, %v281_v11 }
  0xe2   : > { %295 = vperm.xlu1 %492, %v286_v13  }
 0x14c   : > { %v291_v14 = vpop.permute.xlu1 %290 }
 0x14d   : > { %v298_v15 = vmul.f32 %v291_v14, %v754_v0  ;;  %v299_v16 = vmul.f32 %v291_v14, %v756_v1 }
 0x14f   : > { %302 = vst [vmem:[%s177_s14] sm:$0xff] %v298_v15 }
 0x150   : > { %303 = vst [vmem:[%s177_s14 + $0x8] sm:$0xff] %v299_v16 }
 0x154   : > { %v296_v17 = vpop.permute.xlu1 %295 }
 0x155   : > { %v300_v18 = vmul.f32 %v296_v17, %v760_v3  ;;  %v301_v19 = vmul.f32 %v296_v17, %v762_v4 }
 0x157   : > { %304 = vst [vmem:[%s177_s14 + $0x10] sm:$0xff] %v300_v18 }
 0x158   : > { %305 = vst [vmem:[%s177_s14 + $0x18] sm:$0xff] %v301_v19 }
 0x159   : > { %576 = shalt.err (!%p573_p8)
}
 0x15a   : > { %s626_s4 = smov 256   ;;  %s627_s28 = smov 16  }
 0x15b   : > { %435 = dma.vmem_to_hbm [thread:$0]  (%p695_p11), %s320_s24, 512, %s322_s25, %s307_s13, %s626_s4, %s626_s4, %s627_s28  }
 0x15c PF: > { %s336_s20 = sand.u32 1, %s607_s9   ;;  %p814_p9 = scmp.ge.s32.totalorder %s619_s12, 2 }
 0x15d   : > { %s337_s23 = scalar_lea.sflag [#allocation4], %s336_s20 }
 0x15e   : > { %p446_p10 = pnand %p814_p9, %p699_p12 }
 0x160   : > { %p447_p1 = pneg %p446_p10 }
 0x162   : > { %602 = dma.done.wait (%p447_p1), %s337_s23, 512  }
 0x163   : > { %604 = vsyncadd (%p447_p1), %s337_s23, 4294966784  ;;  %p16_p2 = scmp.ge.s32.totalorder %s668_s15, 4   ;;  %s815_s9 = smov %s611_s10 }
 0x164   : > { %s816_s10 = smov %s615_s11  ;;  %s817_s11 = smov %s680_s18 }
 0x165   : > { %s818_s12 = smov %s668_s15  ;;  %18 = sbr.rel (!%p16_p2) target bundleno = 6 (0x6), region = 78 }
 0x16a   :  { %343 = vsyncpa [#allocation3], 1 }
 0x16b   :  { %345 = vsyncpa [#allocation3 + $0x1], 1 }
 0x16c   :  { %346 = vsyncpa [#allocation4], 1 }
 0x16d   :  { %348 = vsyncpa [#allocation4 + $0x1], 1 }
 0x16e   :  { %349 = vsyncpa [#allocation5], 1 }
 0x16f   :  { %351 = vsyncpa [#allocation5 + $0x1], 1 }

</bundles_post_ra>
